<compile_context>
chip_gen: v7x
topology: tpu7x:2x2x1
jax: 0.10.0
libtpu: 0.0.40
codegen_flags: <defaults>
</compile_context>

<pallas_src>
import functools

import jax
import jax.numpy as jnp
from jax.experimental import pallas as pl
from jax.experimental.pallas import tpu as pltpu

# Module hyper-parameters (no learned weights).
EPSILON = 1e-6
THRESHOLD = 0.1
ALPHA = 0.5


def _qfa_kernel(s_row_ref, st_col_ref, attn_ref, ctx_ref, acc_ref, *, approx):
    """One (batch, i-tile, j-tile) grid step.

    s_row_ref : (1, TM, 2)  row ("query") states tile
    st_col_ref: (1, 2, TN)  transposed column ("key/value") states tile
    attn_ref  : (1, TM, TN) attention tile (written every step)
    ctx_ref   : (1, TM, 2)  context rows (written at the last j step)
    acc_ref   : (TM, 2) f32 context accumulator across the j grid axis
    """
    j = pl.program_id(2)

    s_row = s_row_ref[0].astype(jnp.float32)          # [TM, 2]
    st = st_col_ref[0].astype(jnp.float32)            # [2, TN], lane-dense

    s0 = st[0:1, :]                                   # [1, TN]
    s1 = st[1:2, :]                                   # [1, TN]
    # Fused similarity operand rows:
    #   m0 = s_j0 + a*s_j1,  m1 = s_j1 - a*s_j0
    # so that sim[i,j] = <s_i, s_j> + a * <s_i, orth(s_j)>.
    m0 = s0 + ALPHA * s1                              # [1, TN]
    m1 = s1 - ALPHA * s0                              # [1, TN]

    r0 = s_row[:, 0:1]                                # [TM, 1]
    r1 = s_row[:, 1:2]                                # [TM, 1]

    # Pure VPU broadcast multiply-adds (no MXU).
    sim = r0 * m0 + r1 * m1                           # [TM, TN]

    abs_sim = jnp.abs(sim)
    if approx:
        # EUP approximate reciprocal for the values; the threshold decision is
        # taken exactly from |sim| (1/(eps+|s|) > thr  <=>  |s| < 1/thr - eps).
        gate = pl.reciprocal(EPSILON + abs_sim, approx=True)
        mask = abs_sim < (1.0 / THRESHOLD - EPSILON)
    else:
        # Bit-faithful to the reference: exact divide, mask on the exact gate.
        gate = 1.0 / (EPSILON + abs_sim)
        mask = gate > THRESHOLD
    attn = jnp.where(mask, sim * gate, 0.0)           # f32 values

    attn_ref[0] = attn.astype(attn_ref.dtype)

    # context[i, k] = sum_j attention[i, j] * states[j, k]
    # VPU multiply + XLU lane-reduce against the lane-dense states rows
    # (no [t, t] x [t, 2] MXU pass), accumulated in f32 across the j axis.
    @pl.when(j == 0)
    def _():
        acc_ref[...] = jnp.zeros_like(acc_ref)

    c0 = jnp.sum(attn * s0, axis=-1, keepdims=True)   # [TM, 1]
    c1 = jnp.sum(attn * s1, axis=-1, keepdims=True)   # [TM, 1]
    acc_ref[...] += jnp.concatenate([c0, c1], axis=1)

    @pl.when(j == pl.num_programs(2) - 1)
    def _():
        ctx_ref[0] = acc_ref[...].astype(ctx_ref.dtype)


def _pick_tile(n, max_tile, quantum=128):
    """Largest multiple of `quantum` that divides `n` and is <= max_tile."""
    t = min(max_tile, n)
    t = max((t // quantum) * quantum, quantum)
    while t > quantum and n % t != 0:
        t -= quantum
    return t


def _ceil_to(x, m):
    return ((x + m - 1) // m) * m


def _block_bytes(shape, dtype):
    """Conservative padded VMEM footprint of one buffered block."""
    itemsize = jnp.dtype(dtype).itemsize
    padded = list(shape)
    padded[-1] = _ceil_to(padded[-1], 128)
    if len(padded) >= 2:
        padded[-2] = _ceil_to(padded[-2], 8)
    n = 1
    for d in padded:
        n *= d
    return n * itemsize


def quantum_flux_attention(states, *, tile=1024, approx_reciprocal=False,
                           attn_dtype=None, attn_buffers=2):
    """states: [B, N, 2] -> (attention [B, N, N], context [B, N, 2]).

    attn_dtype=jnp.bfloat16 halves the dominant HBM write (attention values
    are bounded in [-1, 1]); context stays exact in the input dtype.
    """
    B, N, D = states.shape
    assert D == 2, "QuantumFluxAttention expects states with last dim 2"
    assert tile % 128 == 0, "tile must be a multiple of 128 (lane-dense)"
    dtype = states.dtype
    attn_dtype = attn_dtype or dtype

    # Pad N only up to the next multiple of 128 (zero states produce exactly
    # zero attention/context contributions, so padding is benign), and pick the
    # tile as a divisor of that so no extra padding / post-slice is needed when
    # N is already 128-aligned.
    n_pad = _ceil_to(N, 128)
    tj = _pick_tile(n_pad, tile)
    ti = tj
    # v7x megacore: make sure the parallel grid extent B * (n_pad // ti) >= 2.
    if B * (n_pad // ti) < 2:
        ti = n_pad // 2            # multiple of 64, divides n_pad exactly

    states_p = states
    if n_pad != N:
        states_p = jnp.pad(states, ((0, 0), (0, n_pad - N), (0, 0)))
    # Lane-dense transposed copy for the column operand (tiny: [B, 2, N]).
    states_t = jnp.transpose(states_p, (0, 2, 1))

    grid = (B, n_pad // ti, n_pad // tj)   # j (context reduction) innermost

    kernel = functools.partial(_qfa_kernel, approx=approx_reciprocal)

    attn_spec_kwargs = {}
    if attn_buffers > 2:
        attn_spec_kwargs["pipeline_mode"] = pl.Buffered(attn_buffers)
    attn_out_spec = pl.BlockSpec((1, ti, tj), lambda b, i, j: (b, i, j),
                                 **attn_spec_kwargs)

    # Derive the VMEM limit from the actual buffered block sizes + headroom.
    nbuf_attn = max(2, attn_buffers)
    vmem_bytes = (
        nbuf_attn * _block_bytes((1, ti, tj), attn_dtype)   # attention out
        + 2 * _block_bytes((1, ti, D), dtype)               # row states in
        + 2 * _block_bytes((1, D, tj), dtype)               # transposed states
        + 2 * _block_bytes((1, ti, D), dtype)               # context out
        + _block_bytes((ti, D), jnp.float32)                # accumulator
    )
    vmem_limit = vmem_bytes + 4 * 1024 * 1024

    attn_p, ctx_p = pl.pallas_call(
        kernel,
        out_shape=(
            jax.ShapeDtypeStruct((B, n_pad, n_pad), attn_dtype),
            jax.ShapeDtypeStruct((B, n_pad, D), dtype),
        ),
        grid_spec=pltpu.PrefetchScalarGridSpec(
            num_scalar_prefetch=0,
            grid=grid,
            in_specs=[
                pl.BlockSpec((1, ti, D), lambda b, i, j: (b, i, 0)),  # rows
                pl.BlockSpec((1, D, tj), lambda b, i, j: (b, 0, j)),  # cols^T
            ],
            out_specs=(
                attn_out_spec,                                        # attention
                pl.BlockSpec((1, ti, D), lambda b, i, j: (b, i, 0)),  # context
            ),
            scratch_shapes=[pltpu.VMEM((ti, D), jnp.float32)],
        ),
        compiler_params=pltpu.CompilerParams(
            dimension_semantics=("parallel", "parallel", "arbitrary"),
            vmem_limit_bytes=int(vmem_limit),
        ),
    )(states_p, states_t)

    if n_pad != N:
        attn_p = attn_p[:, :N, :N]
        ctx_p = ctx_p[:, :N, :]
    return attn_p, ctx_p


def _reference(states):
    """Pure-JAX reference mirroring the PyTorch forward exactly."""
    direct_sim = jnp.einsum("bik,bjk->bij", states, states)
    states_orth = jnp.stack([states[:, :, 1], -states[:, :, 0]], axis=-1)
    ortho_sim = jnp.einsum("bik,bjk->bij", states, states_orth)
    similarity = direct_sim + ALPHA * ortho_sim
    gate = 1.0 / (EPSILON + jnp.abs(similarity))
    mask = (gate > THRESHOLD).astype(similarity.dtype)
    attention = similarity * mask * gate
    context = jnp.einsum("bij,bjk->bik", attention, states)
    return attention, context


if __name__ == "__main__":
    B, N, D = 2, 8, 2
    key = jax.random.PRNGKey(0)
    states = jax.random.normal(key, (B, N, D), dtype=jnp.float32)

    ref_attn, ref_ctx = _reference(states)

    # Exact path (default): f32 attention, exact reciprocal/gate.
    attn, ctx = quantum_flux_attention(states)
    attn, ctx = jax.block_until_ready((attn, ctx))
    assert attn.shape == (B, N, N) and ctx.shape == (B, N, D)
    assert jnp.allclose(attn, ref_attn, atol=2e-3, rtol=2e-3)
    assert jnp.allclose(ctx, ref_ctx, atol=2e-3, rtol=2e-3)

    # Fast path: bf16 attention output + EUP approximate reciprocal
    # (context is still accumulated from f32 attention values).
    attn_f, ctx_f = quantum_flux_attention(states, attn_dtype=jnp.bfloat16,
                                           approx_reciprocal=True)
    attn_f, ctx_f = jax.block_until_ready((attn_f, ctx_f))
    assert attn_f.dtype == jnp.bfloat16
    assert jnp.allclose(attn_f.astype(jnp.float32), ref_attn,
                        atol=5e-2, rtol=5e-2)
    assert jnp.allclose(ctx_f, ref_ctx, atol=5e-2, rtol=5e-2)

    print("KERNEL_OK")
</pallas_src>

<mosaic_0001>
module attributes {stable_mosaic.version = 11 : i64} {
  func.func @_qfa_kernel(%arg0: i32, %arg1: i32, %arg2: i32, %arg3: memref<1x128x2xf32, #tpu.memory_space<vmem>>, %arg4: memref<1x2x128xf32, #tpu.memory_space<vmem>>, %arg5: memref<1x128x128xf32, #tpu.memory_space<vmem>>, %arg6: memref<1x128x2xf32, #tpu.memory_space<vmem>>, %arg7: memref<128x2xf32, #tpu.memory_space<vmem>>) attributes {dimension_semantics = [#tpu.dimension_semantics<parallel>, #tpu.dimension_semantics<parallel>, #tpu.dimension_semantics<arbitrary>], iteration_bounds = array<i64: 2, 1, 1>, scalar_prefetch = 0 : i64, scratch_operands = 1 : i64, tpu.core_type = #tpu.core_type<tc>, window_params = [{transform_indices = @transform_0, window_bounds = array<i64: 1, 128, 2>}, {transform_indices = @transform_1, window_bounds = array<i64: 1, 2, 128>}, {transform_indices = @transform_2, window_bounds = array<i64: 1, 128, 128>}, {transform_indices = @transform_3, window_bounds = array<i64: 1, 128, 2>}]} {
    %c0 = arith.constant 0 : index
    %c0_0 = arith.constant 0 : index
    %c0_1 = arith.constant 0 : index
    %0 = vector.load %arg3[%c0, %c0_0, %c0_1] : memref<1x128x2xf32, #tpu.memory_space<vmem>>, vector<1x128x2xf32>
    %1 = vector.shape_cast %0 : vector<1x128x2xf32> to vector<128x2xf32>
    %c0_2 = arith.constant 0 : index
    %c0_3 = arith.constant 0 : index
    %c0_4 = arith.constant 0 : index
    %2 = vector.load %arg4[%c0_2, %c0_3, %c0_4] : memref<1x2x128xf32, #tpu.memory_space<vmem>>, vector<1x2x128xf32>
    %3 = vector.shape_cast %2 : vector<1x2x128xf32> to vector<2x128xf32>
    %4 = vector.extract_strided_slice %3 {offsets = [0, 0], sizes = [1, 128], strides = [1, 1]} : vector<2x128xf32> to vector<1x128xf32>
    %5 = vector.extract_strided_slice %3 {offsets = [1, 0], sizes = [1, 128], strides = [1, 1]} : vector<2x128xf32> to vector<1x128xf32>
    %cst = arith.constant 5.000000e-01 : f32
    %6 = vector.broadcast %cst : f32 to vector<1x128xf32>
    %7 = arith.mulf %6, %5 : vector<1x128xf32>
    %8 = arith.addf %4, %7 : vector<1x128xf32>
    %cst_5 = arith.constant 5.000000e-01 : f32
    %9 = vector.broadcast %cst_5 : f32 to vector<1x128xf32>
    %10 = arith.mulf %9, %4 : vector<1x128xf32>
    %11 = arith.subf %5, %10 : vector<1x128xf32>
    %12 = vector.extract_strided_slice %1 {offsets = [0, 0], sizes = [128, 1], strides = [1, 1]} : vector<128x2xf32> to vector<128x1xf32>
    %13 = vector.extract_strided_slice %1 {offsets = [0, 1], sizes = [128, 1], strides = [1, 1]} : vector<128x2xf32> to vector<128x1xf32>
    %14 = vector.broadcast %12 : vector<128x1xf32> to vector<128x128xf32>
    %15 = vector.broadcast %8 : vector<1x128xf32> to vector<128x128xf32>
    %16 = arith.mulf %14, %15 : vector<128x128xf32>
    %17 = vector.broadcast %13 : vector<128x1xf32> to vector<128x128xf32>
    %18 = vector.broadcast %11 : vector<1x128xf32> to vector<128x128xf32>
    %19 = arith.mulf %17, %18 : vector<128x128xf32>
    %20 = arith.addf %16, %19 : vector<128x128xf32>
    %21 = math.absf %20 : vector<128x128xf32>
    %cst_6 = arith.constant 9.99999997E-7 : f32
    %22 = vector.broadcast %cst_6 : f32 to vector<128x128xf32>
    %23 = arith.addf %22, %21 : vector<128x128xf32>
    %cst_7 = arith.constant 1.000000e+00 : f32
    %24 = vector.broadcast %cst_7 : f32 to vector<128x128xf32>
    %25 = arith.divf %24, %23 : vector<128x128xf32>
    %cst_8 = arith.constant 1.000000e-01 : f32
    %26 = vector.broadcast %cst_8 : f32 to vector<128x128xf32>
    %27 = arith.cmpf ogt, %25, %26 : vector<128x128xf32>
    %28 = arith.mulf %20, %25 : vector<128x128xf32>
    %cst_9 = arith.constant 0.000000e+00 : f32
    %29 = vector.broadcast %cst_9 : f32 to vector<128x128xf32>
    %30 = arith.select %27, %28, %29 : vector<128x128xi1>, vector<128x128xf32>
    %c0_10 = arith.constant 0 : index
    %c0_11 = arith.constant 0 : index
    %c0_12 = arith.constant 0 : index
    %31 = vector.load %arg5[%c0_10, %c0_11, %c0_12] : memref<1x128x128xf32, #tpu.memory_space<vmem>>, vector<1x128x128xf32>
    %32 = vector.shape_cast %31 : vector<1x128x128xf32> to vector<128x128xf32>
    %33 = vector.shape_cast %30 : vector<128x128xf32> to vector<1x128x128xf32>
    tpu.vector_store %arg5[%c0_10, %c0_11, %c0_12], %33 {strides = array<i32>} : memref<1x128x128xf32, #tpu.memory_space<vmem>>, vector<1x128x128xf32>,
    %c0_i32 = arith.constant 0 : i32
    %34 = arith.cmpi eq, %arg2, %c0_i32 : i32
    %35 = arith.extui %34 : i1 to i32
    %c0_i32_13 = arith.constant 0 : i32
    %36 = arith.cmpi ne, %35, %c0_i32_13 : i32
    scf.if %36 {
      %cst_22 = arith.constant 0.000000e+00 : f32
      %52 = vector.broadcast %cst_22 : f32 to vector<128x2xf32>
      %c0_23 = arith.constant 0 : index
      %c0_24 = arith.constant 0 : index
      %53 = vector.load %arg7[%c0_23, %c0_24] : memref<128x2xf32, #tpu.memory_space<vmem>>, vector<128x2xf32>
      tpu.vector_store %arg7[%c0_23, %c0_24], %52 {strides = array<i32>} : memref<128x2xf32, #tpu.memory_space<vmem>>, vector<128x2xf32>,
    } else {
    }
    %37 = vector.broadcast %4 : vector<1x128xf32> to vector<128x128xf32>
    %38 = arith.mulf %30, %37 : vector<128x128xf32>
    %cst_14 = arith.constant dense<0.000000e+00> : vector<128xf32>
    %39 = vector.multi_reduction <add>, %38, %cst_14 [1] : vector<128x128xf32> to vector<128xf32>
    %40 = vector.shape_cast %39 : vector<128xf32> to vector<128x1xf32>
    %41 = vector.broadcast %5 : vector<1x128xf32> to vector<128x128xf32>
    %42 = arith.mulf %30, %41 : vector<128x128xf32>
    %cst_15 = arith.constant dense<0.000000e+00> : vector<128xf32>
    %43 = vector.multi_reduction <add>, %42, %cst_15 [1] : vector<128x128xf32> to vector<128xf32>
    %44 = vector.shape_cast %43 : vector<128xf32> to vector<128x1xf32>
    %c0_16 = arith.constant 0 : index
    %c0_17 = arith.constant 0 : index
    %45 = vector.load %arg7[%c0_16, %c0_17] : memref<128x2xf32, #tpu.memory_space<vmem>>, vector<128x2xf32>
    %46 = tpu.concatenate %40, %44 in 1 : vector<128x1xf32>, vector<128x1xf32> -> vector<128x2xf32>
    %47 = arith.addf %45, %46 : vector<128x2xf32>
    %c0_18 = arith.constant 0 : index
    %c0_19 = arith.constant 0 : index
    %48 = vector.load %arg7[%c0_18, %c0_19] : memref<128x2xf32, #tpu.memory_space<vmem>>, vector<128x2xf32>
    tpu.vector_store %arg7[%c0_18, %c0_19], %47 {strides = array<i32>} : memref<128x2xf32, #tpu.memory_space<vmem>>, vector<128x2xf32>,
    %c0_i32_20 = arith.constant 0 : i32
    %49 = arith.cmpi eq, %arg2, %c0_i32_20 : i32
    %50 = arith.extui %49 : i1 to i32
    %c0_i32_21 = arith.constant 0 : i32
    %51 = arith.cmpi ne, %50, %c0_i32_21 : i32
    scf.if %51 {
      %c0_22 = arith.constant 0 : index
      %c0_23 = arith.constant 0 : index
      %52 = vector.load %arg7[%c0_22, %c0_23] : memref<128x2xf32, #tpu.memory_space<vmem>>, vector<128x2xf32>
      %c0_24 = arith.constant 0 : index
      %c0_25 = arith.constant 0 : index
      %c0_26 = arith.constant 0 : index
      %53 = vector.load %arg6[%c0_24, %c0_25, %c0_26] : memref<1x128x2xf32, #tpu.memory_space<vmem>>, vector<1x128x2xf32>
      %54 = vector.shape_cast %53 : vector<1x128x2xf32> to vector<128x2xf32>
      %55 = vector.shape_cast %52 : vector<128x2xf32> to vector<1x128x2xf32>
      tpu.vector_store %arg6[%c0_24, %c0_25, %c0_26], %55 {strides = array<i32>} : memref<1x128x2xf32, #tpu.memory_space<vmem>>, vector<1x128x2xf32>,
    } else {
    }
    return
  }
  func.func @transform_0(%arg0: i32, %arg1: i32, %arg2: i32) -> (i32, i32, i32) {
    %c0_i32 = arith.constant 0 : i32
    %c0_i32_0 = arith.constant 0 : i32
    return %arg0, %arg1, %c0_i32 : i32, i32, i32
  }
  func.func @transform_1(%arg0: i32, %arg1: i32, %arg2: i32) -> (i32, i32, i32) {
    %c0_i32 = arith.constant 0 : i32
    %c0_i32_0 = arith.constant 0 : i32
    return %arg0, %c0_i32, %arg2 : i32, i32, i32
  }
  func.func @transform_2(%arg0: i32, %arg1: i32, %arg2: i32) -> (i32, i32, i32) {
    %c0_i32 = arith.constant 0 : i32
    return %arg0, %arg1, %arg2 : i32, i32, i32
  }
  func.func @transform_3(%arg0: i32, %arg1: i32, %arg2: i32) -> (i32, i32, i32) {
    %c0_i32 = arith.constant 0 : i32
    %c0_i32_0 = arith.constant 0 : i32
    return %arg0, %arg1, %c0_i32 : i32, i32, i32
  }
}

</mosaic_0001>

<bundles_post_ra>
// kernel: tpu_custom_call.1
= control target key start
LH: loop header
LB: loop body
LE: loop exit
PB: predicated region body
PF: predicated region fallthrough
CT: control target
= control target key end

     0   :  { %9 = vsyncpa [#allocation4], 0  ;;  %s1712_s0 = inlined_call_operand.vmem [shape: f32[2,128,2], index: 0, kind: input, shape index: {}]   ;;  %s1713_s1 = inlined_call_operand.vmem [shape: f32[2,2,128], index: 1, kind: input, shape index: {}]   ;;  %s1714_s2 = inlined_call_operand.hbm [shape: f32[2,128,128], index: 2, kind: output, shape index: {0}]   ;;  %s1715_s3 = inlined_call_operand.vmem [shape: f32[2,128,2], index: 3, kind: output, shape index: {1}]  }
   0x1   :  { %11 = vsyncpa [#allocation4 + $0x1], 0  ;;  %s1226_s12 = smov 0   ;;  %s1228_s13 = smov 0  }
   0x2   :  { %s1230_s14 = smov 0   ;;  %s1232_s15 = smov 0  }
   0x3   :  { %s1234_s16 = smov 0   ;;  %s1236_s17 = smov 0  }
   0x4 LB: > { %s1005_s18 = sadd.s32 4294967295, %s1198_s17   ;;  %s1006_s19 = sadd.s32 4294967294, %s1198_s17   ;;  %s1198_s17 = sphi %s1236_s17, %s17_s17   ;;  %s1194_s16 = sphi %s1234_s16, %s1722_s16   ;;  %s1190_s15 = sphi %s1232_s15, %s1721_s15   ;;  %s1186_s14 = sphi %s1230_s14, %s1720_s14   ;;  %s1182_s13 = sphi %s1228_s13, %s1719_s13   ;;  %s1178_s12 = sphi %s1226_s12, %s1718_s12  }
   0x5   : > { %s36_s20 = sadd.s32 1, %s1194_s16  ;;  %s103_s21 = sadd.s32 1, %s1186_s14 }
   0x6   : > { %p38_p0 = scmp.ge.s32.totalorder %s36_s20, 2  ;;  %p113_p1 = scmp.ne.s32.totalorder %s1186_s14, %s1182_s13 }
   0x7   : > { %p114_p2 = scmp.eq.s32.totalorder %s1005_s18, 1  ;;  %p119_p3 = scmp.ne.s32.totalorder %s1182_s13, %s1178_s12 }
   0x8   : > { %s1724_s20 = smov (%p38_p0, %s36_s20), 0  ;;  %p120_p5 = scmp.eq.s32.totalorder %s1006_s19, 1 }
   0x9   : > { %p1266_p4 = por %p114_p2, %p113_p1  ;;  %s96_s23 = ssub.s32 %s1194_s16, %s1724_s20 }
   0xa   : > { %p1009_p6 = scmp.ge.s32.totalorder %s1198_s17, 1  ;;  %p101_p7 = scmp.eq.s32.totalorder %s96_s23, 0 }
   0xb   : > { %p1273_p8 = por %p120_p5, %p119_p3  ;;  %p189_p9 = scmp.lt.s32.totalorder %s1198_s17, 3 }
   0xc   : > { %s1279_s25 = scalar_select %p101_p7, %s1186_s14, %s103_s21  }
   0xd   : > { %p190_p10 = pnand %p1009_p6, %p189_p9 }
   0xe   : > { %p234_p11 = scmp.lt.s32.totalorder (!%p190_p10), %s1190_s15, 1  ;;  %v1200_v0 = vmov (!%p190_p10), 0   ;;  %v1201_v17 = vmov (!%p190_p10), 1   ;;  %v366_v30 = vlaneseq (!%p190_p10)  ;;  %s219_s8 = sand.u32 (!%p190_p10), 1, %s1182_s13  }
   0xf   : > { %193 = sbr.rel (%p190_p10) target bundleno = 431 (0x1af), region = 28  ;;  %1085 = vset.pattern.permute.xlu1 (!%p190_p10), %v1200_v0  ;;  %1084 = vset.pattern.permute.xlu0 (!%p190_p10), %v1200_v0  ;;  %s1010_s9 = sshll.u32 (!%p190_p10), %s219_s8, 7 }
  0x10   : > { %v1306_v34 = vshrl.u32 (!%p190_p10), %v366_v30, 7  ;;  %s1408_s10 = scalar_lea.vmem (!%p190_p10), [#allocation3], %s1010_s9  ;;  %s1023_s11 = sshll.u32 (!%p190_p10), %s1190_s15, 11 }
  0x11   : > { %s866_s18 = sshll.u32 (!%p190_p10), %s1408_s10, 4  ;;  %s1568_s23 = scalar_lea.hbm (!%p190_p10), %s1714_s2, %s1023_s11  ;;  %s1570_s18 = int_to_ptr.vmem [resolvable:$true] %s866_s18 }
  0x12   : > { %v368_v39 = vsub.s32 (!%p190_p10), 0, %v1306_v34  ;;  %v452_v41 = vsub.s32 (!%p190_p10), 1, %v1306_v34  ;;  %s1574_s28 = scalar_lea.sflag (!%p190_p10), [#allocation4], %s219_s8  ;;  %s1120_s29 = scalar_lea.vmem (!%p190_p10), %s1570_s18, 2048 }
  0x13   : > { %p1121_p12 = scmp.ne.s32.totalorder (!%p190_p10), %s1570_s18, %s1120_s29 }
  0x15   : > { %p1122_p13 = pnand (!%p190_p10), %p1121_p12, %p1266_p4 }
  0x16   : > { %s1283_s26 = scalar_select %p234_p11, %s1190_s15, 1 }
  0x17   : > { %p1123_p0 = pneg %p1122_p13  ;;  %s1203_s15 = smov [#allocation3]  }
  0x18   : > { %s1021_s27 = sshll.u32 %s1283_s26, 7  ;;  %s1013_s4 = sshll.u32 %s1283_s26, 1 }
  0x19   : > { %s241_s30 = scalar_lea.vmem %s1712_s0, %s1021_s27  ;;  %s249_s7 = scalar_lea.vmem %s1713_s1, %s1013_s4 }
  0x1a   : > { %v263_v1 = vld [vmem:[%s241_s30 + $0x10] sm:$0xff]  ;;  %v261_v2 = vld [vmem:[%s241_s30] sm:$0xff]  ;;  %v264_v3 = vld [vmem:[%s241_s30 + $0x18] sm:$0xff] }
  0x1b   : > { %298 = vperm.xlu1 %1085, %v263_v1   ;;  %288 = vperm.xlu0 %1084, %v261_v2   ;;  %v262_v4 = vld [vmem:[%s241_s30 + $0x8] sm:$0xff]  ;;  %v265_v6 = vld [vmem:[%s241_s30 + $0x20] sm:$0xff]  ;;  %v268_v7 = vld [vmem:[%s241_s30 + $0x38] sm:$0xff] }
  0x1c   : > { %v266_v5 = vld [vmem:[%s241_s30 + $0x28] sm:$0xff]  ;;  %v267_v8 = vld [vmem:[%s241_s30 + $0x30] sm:$0xff]  ;;  %v269_v10 = vld [vmem:[%s241_s30 + $0x40] sm:$0xff] }
  0x1d   : > { %v270_v9 = vld [vmem:[%s241_s30 + $0x48] sm:$0xff]  ;;  %v272_v11 = vld [vmem:[%s241_s30 + $0x58] sm:$0xff]  ;;  %v271_v12 = vld [vmem:[%s241_s30 + $0x50] sm:$0xff] }
  0x1e   : > { %v274_v13 = vld [vmem:[%s241_s30 + $0x68] sm:$0xff]  ;;  %v273_v14 = vld [vmem:[%s241_s30 + $0x60] sm:$0xff]  ;;  %v276_v15 = vld [vmem:[%s241_s30 + $0x78] sm:$0xff] }
  0x1f   : > { %303 = vperm.xlu1 %1085, %v264_v3   ;;  %293 = vperm.xlu0 %1084, %v262_v4   ;;  %v275_v16 = vld [vmem:[%s241_s30 + $0x70] sm:$0xff]  ;;  %v1295_v26 = vld [vmem:[%s249_s7] sm:$0x3]  ;;  %s1124_s30 = sshll.u32 %s1203_s15, 4  ;;  %s1125_s30 = int_to_ptr.vmem [resolvable:$false] %s1124_s30 }
  0x20   : > { %v278_v29 = vmul.f32 0.5, %v1295_v26  ;;  %s1126_s4 = scalar_lea.vmem %s1125_s30, 4096  ;;  %p1127_p1 = scmp.lt.s32.totalorder %s1570_s18, %s1125_s30 }
  0x21   : > { %p1128_p2 = scmp.lt.s32.totalorder %s1126_s4, %s1120_s29 }
  0x22   : > { %v280_v33 = vrot.slane %v278_v29, 1  ;;  %v283_v35 = vrot.slane %v278_v29, 7 }
  0x23   : > { %313 = vperm.xlu1 %1085, %v266_v5   ;;  %308 = vperm.xlu0 %1084, %v265_v6   ;;  %p1129_p3 = por %p1128_p2, %p1127_p1 }
  0x24   : > { %v282_v38 = vadd.f32 %v280_v33, %v1295_v26  ;;  %v285_v40 = vsub.f32 %v1295_v26, %v283_v35 }
  0x25   : > { %p1130_p5 = pnand %p1129_p3, %p1123_p0 }
  0x26   : > { %v1320_v44 = vrot.slane %v282_v38, %v368_v39  ;;  %v1324_v45 = vrot.slane %v285_v40, %v452_v41 }
  0x27   : > { %323 = vperm.xlu1 %1085, %v268_v7   ;;  %318 = vperm.xlu0 %1084, %v267_v8  }
  0x2b   : > { %333 = vperm.xlu1 %1085, %v270_v9   ;;  %328 = vperm.xlu0 %1084, %v269_v10  }
  0x2f   : > { %343 = vperm.xlu1 %1085, %v272_v11   ;;  %338 = vperm.xlu0 %1084, %v271_v12  }
  0x33   : > { %353 = vperm.xlu1 %1085, %v274_v13   ;;  %348 = vperm.xlu0 %1084, %v273_v14  }
  0x37   : > { %363 = vperm.xlu1 %1085, %v276_v15   ;;  %358 = vperm.xlu0 %1084, %v275_v16  }
  0x3b   : > { %1087 = vset.pattern.permute.xlu1 %v1201_v17  ;;  %1086 = vset.pattern.permute.xlu0 %v1201_v17 }
  0x3c   : > { %391 = vperm.xlu1 %1087, %v262_v4   ;;  %387 = vperm.xlu0 %1086, %v261_v2  }
  0x40   : > { %395 = vperm.xlu1 %1087, %v263_v1   ;;  %399 = vperm.xlu0 %1086, %v264_v3  }
  0x44   : > { %403 = vperm.xlu1 %1087, %v265_v6   ;;  %407 = vperm.xlu0 %1086, %v266_v5  }
  0x48   : > { %411 = vperm.xlu1 %1087, %v267_v8   ;;  %415 = vperm.xlu0 %1086, %v268_v7  }
  0x4c   : > { %419 = vperm.xlu1 %1087, %v269_v10   ;;  %423 = vperm.xlu0 %1086, %v270_v9  }
  0x50   : > { %427 = vperm.xlu1 %1087, %v271_v12   ;;  %431 = vperm.xlu0 %1086, %v272_v11  }
  0x54   : > { %435 = vperm.xlu1 %1087, %v273_v14   ;;  %439 = vperm.xlu0 %1086, %v274_v13  }
  0x58   : > { %443 = vperm.xlu1 %1087, %v275_v16   ;;  %447 = vperm.xlu0 %1086, %v276_v15  }
  0x9a   : > { %v299_v18 = vpop.permute.xlu1 %298  ;;  %v289_v19 = vpop.permute.xlu0 %288 }
  0x9b   : > { %v370_v48 = vmul.f32 %v1320_v44, %v289_v19  ;;  %v372_v54 = vmul.f32 %v1320_v44, %v299_v18 }
  0x9e   : > { %v304_v20 = vpop.permute.xlu1 %303  ;;  %v294_v21 = vpop.permute.xlu0 %293 }
  0x9f   : > { %v371_v49 = vmul.f32 %v1320_v44, %v294_v21  ;;  %v373_v55 = vmul.f32 %v1320_v44, %v304_v20 }
  0xa2   : > { %v314_v22 = vpop.permute.xlu1 %313  ;;  %v309_v23 = vpop.permute.xlu0 %308 }
  0xa3   : > { %v374_v2 = vmul.f32 %v1320_v44, %v309_v23  ;;  %v375_v8 = vmul.f32 %v1320_v44, %v314_v22  ;;  %v1361_v22 = vrot.slane %v1295_v26, %v368_v39 }
  0xa6   : > { %v324_v24 = vpop.permute.xlu1 %323  ;;  %v319_v25 = vpop.permute.xlu0 %318 }
  0xa7   : > { %v377_v13 = vmul.f32 %v1320_v44, %v324_v24  ;;  %v376_v14 = vmul.f32 %v1320_v44, %v319_v25 }
  0xaa   : > { %v1297_v27 = vpop.permute.xlu1 %333  ;;  %v1299_v28 = vpop.permute.xlu0 %328 }
  0xab   : > { %v379_v23 = vmul.f32 %v1320_v44, %v1297_v27  ;;  %v378_v30 = vmul.f32 %v1320_v44, %v1299_v28 }
  0xae   : > { %v1302_v31 = vpop.permute.xlu1 %343  ;;  %v1304_v32 = vpop.permute.xlu0 %338 }
  0xaf   : > { %v381_v33 = vmul.f32 %v1320_v44, %v1302_v31  ;;  %v380_v35 = vmul.f32 %v1320_v44, %v1304_v32 }
  0xb2   : > { %v1308_v36 = vpop.permute.xlu1 %353  ;;  %v1310_v37 = vpop.permute.xlu0 %348 }
  0xb3   : > { %v383_v28 = vmul.f32 %v1320_v44, %v1308_v36  ;;  %v382_v31 = vmul.f32 %v1320_v44, %v1310_v37 }
  0xb6   : > { %v1316_v42 = vpop.permute.xlu1 %363  ;;  %v1318_v43 = vpop.permute.xlu0 %358 }
  0xbb   : > { %v392_v46 = vpop.permute.xlu1 %391  ;;  %v388_v47 = vpop.permute.xlu0 %387 }
  0xbc   : > { %v455_v50 = vmul.f32 %v1324_v45, %v392_v46  ;;  %v454_v51 = vmul.f32 %v1324_v45, %v388_v47 }
  0xbe   : > { %v1330_v52 = vadd.f32 %v455_v50, %v371_v49  ;;  %v1332_v53 = vadd.f32 %v454_v51, %v370_v48  ;;  %v1388_v49 = vmul.f32 %v1320_v44, %v1316_v42 }
  0xbf   : > { %v396_v56 = vpop.permute.xlu1 %395  ;;  %v400_v57 = vpop.permute.xlu0 %399 }
  0xc0   : > { %v487_v58 = vand.u32 2147483647, %v1330_v52  ;;  %v486_v59 = vand.u32 2147483647, %v1332_v53  ;;  %v456_v60 = vmul.f32 %v1324_v45, %v396_v56  ;;  %v457_v61 = vmul.f32 %v1324_v45, %v400_v57 }
  0xc1   : > { %v384_v56 = vmul.f32 %v1320_v44, %v1318_v43 }
  0xc2   : > { %v503_v62 = vadd.f32 1e-06, %v487_v58  ;;  %v502_v63 = vadd.f32 1e-06, %v486_v59  ;;  %v1340_v0 = vadd.f32 %v456_v60, %v372_v54  ;;  %v1342_v1 = vadd.f32 %v457_v61, %v373_v55 }
  0xc3   : > { %v404_v3 = vpop.permute.xlu1 %403  ;;  %v408_v4 = vpop.permute.xlu0 %407 }
  0xc4   : > { %1088 = vrcp.f32 %v503_v62  ;;  %v488_v5 = vand.u32 2147483647, %v1340_v0  ;;  %v489_v6 = vand.u32 2147483647, %v1342_v1  ;;  %v458_v7 = vmul.f32 %v1324_v45, %v404_v3 }
  0xc5   : > { %1090 = vrcp.f32 %v502_v63  ;;  %v459_v9 = vmul.f32 %v1324_v45, %v408_v4 }
  0xc6   : > { %v504_v10 = vadd.f32 1e-06, %v488_v5  ;;  %v505_v11 = vadd.f32 1e-06, %v489_v6  ;;  %v1350_v12 = vadd.f32 %v458_v7, %v374_v2 }
  0xc7   : > { %v1354_v15 = vadd.f32 %v459_v9, %v375_v8  ;;  %v412_v16 = vpop.permute.xlu1 %411  ;;  %v416_v17 = vpop.permute.xlu0 %415 }
  0xc8   : > { %1092 = vrcp.f32 %v504_v10  ;;  %v490_v18 = vand.u32 2147483647, %v1350_v12  ;;  %v460_v19 = vmul.f32 %v1324_v45, %v412_v16  ;;  %v461_v20 = vmul.f32 %v1324_v45, %v416_v17 }
  0xc9   : > { %1094 = vrcp.f32 %v505_v11  ;;  %v491_v21 = vand.u32 2147483647, %v1354_v15 }
  0xca   : > { %v506_v24 = vadd.f32 1e-06, %v490_v18  ;;  %v1366_v25 = vadd.f32 %v460_v19, %v376_v14  ;;  %v1368_v29 = vadd.f32 %v461_v20, %v377_v13 }
  0xcb   : > { %v507_v38 = vadd.f32 1e-06, %v491_v21  ;;  %v420_v39 = vpop.permute.xlu1 %419  ;;  %v424_v40 = vpop.permute.xlu0 %423 }
  0xcc   : > { %1096 = vrcp.f32 %v506_v24  ;;  %v492_v27 = vand.u32 2147483647, %v1366_v25  ;;  %v493_v46 = vand.u32 2147483647, %v1368_v29  ;;  %v462_v47 = vmul.f32 %v1324_v45, %v420_v39 }
  0xcd   : > { %1098 = vrcp.f32 %v507_v38  ;;  %v463_v32 = vmul.f32 %v1324_v45, %v424_v40 }
  0xce   : > { %v1089_v48 = vpop.eup %1088  ;;  %v508_v50 = vadd.f32 1e-06, %v492_v27  ;;  %v509_v51 = vadd.f32 1e-06, %v493_v46  ;;  %v1390_v54 = vadd.f32 %v462_v47, %v378_v30 }
  0xcf   : > { %v1091_v55 = vpop.eup %1090  ;;  %v567_v36 = vmul.f32 %v1089_v48, %v1330_v52  ;;  %v1395_v57 = vadd.f32 %v463_v32, %v379_v23  ;;  %v428_v37 = vpop.permute.xlu1 %427  ;;  %vm551_vm0 = vcmp.gt.f32.partialorder %v1089_v48, 0.1 }
  0xd0   : > { %v432_v58 = vpop.permute.xlu0 %431  ;;  %v566_v59 = vmul.f32 %v1091_v55, %v1332_v53  ;;  %1100 = vrcp.f32 %v508_v50  ;;  %v494_v42 = vand.u32 2147483647, %v1390_v54  ;;  %v464_v60 = vmul.f32 %v1324_v45, %v428_v37 }
  0xd1   : > { %1102 = vrcp.f32 %v509_v51  ;;  %v495_v61 = vand.u32 2147483647, %v1395_v57  ;;  %v465_v62 = vmul.f32 %v1324_v45, %v432_v58  ;;  %v1402_v43 = vsel %vm551_vm0, %v567_v36, 0.0 }
  0xd2   : > { %v1093_v44 = vpop.eup %1092  ;;  %v510_v52 = vadd.f32 1e-06, %v494_v42  ;;  %v1404_v63 = vadd.f32 %v464_v60, %v380_v35  ;;  %v640_v2 = vmul.f32 %v1361_v22, %v1402_v43  ;;  %599 = vst [vmem:[%s1408_s10 + $0x8] sm:$0xff] %v1402_v43  ;;  %vm550_vm1 = vcmp.gt.f32.partialorder %v1091_v55, 0.1 }
  0xd3   : > { %v1095_v53 = vpop.eup %1094  ;;  %v568_v3 = vmul.f32 %v1093_v44, %v1340_v0  ;;  %v511_v4 = vadd.f32 1e-06, %v495_v61  ;;  %v1413_v5 = vadd.f32 %v465_v62, %v381_v33  ;;  %v436_v6 = vpop.permute.xlu1 %435  ;;  %v1415_v8 = vsel %vm550_vm1, %v566_v59, 0.0 }
  0xd4   : > { %v440_v7 = vpop.permute.xlu0 %439  ;;  %v569_v9 = vmul.f32 %v1095_v53, %v1342_v1  ;;  %1104 = vrcp.f32 %v510_v52  ;;  %v496_v10 = vand.u32 2147483647, %v1404_v63  ;;  %v466_v11 = vmul.f32 %v1324_v45, %v436_v6  ;;  %657 = vadd.xlane.f32.xlu0 %v640_v2  ;;  %598 = vst [vmem:[%s1408_s10] sm:$0xff] %v1415_v8 }
  0xd5   : > { %1106 = vrcp.f32 %v511_v4  ;;  %v497_v0 = vand.u32 2147483647, %v1413_v5  ;;  %v467_v13 = vmul.f32 %v1324_v45, %v440_v7  ;;  %v639_v14 = vmul.f32 %v1361_v22, %v1415_v8 }
  0xd6   : > { %v1097_v16 = vpop.eup %1096  ;;  %v512_v17 = vadd.f32 1e-06, %v496_v10  ;;  %v1426_v1 = vadd.f32 %v466_v11, %v382_v31  ;;  %vm552_vm2 = vcmp.gt.f32.partialorder %v1093_v44, 0.1  ;;  %vm553_vm3 = vcmp.gt.f32.partialorder %v1095_v53, 0.1 }
  0xd7   : > { %v1099_v18 = vpop.eup %1098  ;;  %v570_v19 = vmul.f32 %v1097_v16, %v1350_v12  ;;  %v513_v20 = vadd.f32 1e-06, %v497_v0  ;;  %v1429_v21 = vadd.f32 %v467_v13, %v383_v28  ;;  %655 = vadd.xlane.f32.xlu1 %v639_v14  ;;  %v444_v23 = vpop.permute.xlu1 %443  ;;  %v1431_v30 = vsel %vm552_vm2, %v568_v3, 0.0 }
  0xd8   : > { %v448_v24 = vpop.permute.xlu0 %447  ;;  %v571_v33 = vmul.f32 %v1099_v18, %v1354_v15  ;;  %1108 = vrcp.f32 %v512_v17  ;;  %v498_v35 = vand.u32 2147483647, %v1426_v1  ;;  %v468_v38 = vmul.f32 %v1324_v45, %v444_v23  ;;  %600 = vst [vmem:[%s1408_s10 + $0x10] sm:$0xff] %v1431_v30 }
  0xd9   : > { %1110 = vrcp.f32 %v513_v20  ;;  %v499_v12 = vand.u32 2147483647, %v1429_v21  ;;  %v469_v39 = vmul.f32 %v1324_v45, %v448_v24  ;;  %v641_v40 = vmul.f32 %v1361_v22, %v1431_v30 }
  0xda   : > { %v1101_v27 = vpop.eup %1100  ;;  %v514_v46 = vadd.f32 1e-06, %v498_v35  ;;  %v1442_v47 = vadd.f32 %v468_v38, %v384_v56  ;;  %v1445_v15 = vsel %vm553_vm3, %v569_v9, 0.0  ;;  %vm554_vm4 = vcmp.gt.f32.partialorder %v1097_v16, 0.1 }
  0xdb   : > { %v1103_v28 = vpop.eup %1102  ;;  %v572_v31 = vmul.f32 %v1101_v27, %v1366_v25  ;;  %v515_v32 = vadd.f32 1e-06, %v499_v12  ;;  %v1449_v48 = vadd.f32 %v469_v39, %v1388_v49  ;;  %659 = vadd.xlane.f32.xlu0 %v641_v40  ;;  %v642_v45 = vmul.f32 %v1361_v22, %v1445_v15  ;;  %601 = vst [vmem:[%s1408_s10 + $0x18] sm:$0xff] %v1445_v15 }
  0xdc   : > { %v573_v50 = vmul.f32 %v1103_v28, %v1368_v29  ;;  %1112 = vrcp.f32 %v514_v46  ;;  %v500_v51 = vand.u32 2147483647, %v1442_v47  ;;  %v1457_v55 = vsel %vm554_vm4, %v570_v19, 0.0 }
  0xdd   : > { %1114 = vrcp.f32 %v515_v32  ;;  %v501_v25 = vand.u32 2147483647, %v1449_v48  ;;  %661 = vadd.xlane.f32.xlu1 %v642_v45  ;;  %v643_v49 = vmul.f32 %v1361_v22, %v1457_v55  ;;  %602 = vst [vmem:[%s1408_s10 + $0x20] sm:$0xff] %v1457_v55  ;;  %vm555_vm5 = vcmp.gt.f32.partialorder %v1099_v18, 0.1 }
  0xde   : > { %v1105_v56 = vpop.eup %1104  ;;  %v516_v36 = vadd.f32 1e-06, %v500_v51  ;;  %v1464_v29 = vsel %vm555_vm5, %v571_v33, 0.0  ;;  %vm556_vm6 = vcmp.gt.f32.partialorder %v1101_v27, 0.1  ;;  %v690_v12 = vrot.slane %v1295_v26, %v452_v41 }
  0xdf   : > { %v1107_v37 = vpop.eup %1106  ;;  %v574_v58 = vmul.f32 %v1105_v56, %v1390_v54  ;;  %v517_v59 = vadd.f32 1e-06, %v501_v25  ;;  %663 = vadd.xlane.f32.xlu0 %v643_v49  ;;  %v644_v42 = vmul.f32 %v1361_v22, %v1464_v29  ;;  %603 = vst [vmem:[%s1408_s10 + $0x28] sm:$0xff] %v1464_v29  ;;  %v1471_v60 = vsel %vm556_vm6, %v572_v31, 0.0 }
  0xe0   : > { %v575_v61 = vmul.f32 %v1107_v37, %v1395_v57  ;;  %1116 = vrcp.f32 %v516_v36  ;;  %v645_v62 = vmul.f32 %v1361_v22, %v1471_v60  ;;  %604 = vst [vmem:[%s1408_s10 + $0x30] sm:$0xff] %v1471_v60  ;;  %vm557_vm7 = vcmp.gt.f32.partialorder %v1103_v28, 0.1 }
  0xe1   : > { %1118 = vrcp.f32 %v517_v59  ;;  %665 = vadd.xlane.f32.xlu1 %v644_v42  ;;  %v1478_v54 = vsel %vm557_vm7, %v573_v50, 0.0  ;;  %vm558_vm8 = vcmp.gt.f32.partialorder %v1105_v56, 0.1  ;;  %vm559_vm9 = vcmp.gt.f32.partialorder %v1107_v37, 0.1 }
  0xe2   : > { %v1109_v44 = vpop.eup %1108  ;;  %v646_v52 = vmul.f32 %v1361_v22, %v1478_v54  ;;  %605 = vst [vmem:[%s1408_s10 + $0x38] sm:$0xff] %v1478_v54  ;;  %v1484_v57 = vsel %vm558_vm8, %v574_v58, 0.0  ;;  %v1486_v2 = vsel %vm559_vm9, %v575_v61, 0.0  ;;  %v691_v39 = vmul.f32 %v690_v12, %v1415_v8 }
  0xe3   : > { %v1111_v53 = vpop.eup %1110  ;;  %v576_v3 = vmul.f32 %v1109_v44, %v1404_v63  ;;  %667 = vadd.xlane.f32.xlu0 %v645_v62  ;;  %v647_v4 = vmul.f32 %v1361_v22, %v1484_v57  ;;  %606 = vst [vmem:[%s1408_s10 + $0x40] sm:$0xff] %v1484_v57  ;;  %607 = vst [vmem:[%s1408_s10 + $0x48] sm:$0xff] %v1486_v2  ;;  %vm560_vm10 = vcmp.gt.f32.partialorder %v1109_v44, 0.1  ;;  %vm618_vm0 = vcmask 15360  }
  0xe4   : > { %v577_v6 = vmul.f32 %v1111_v53, %v1413_v5  ;;  %vm561_vm11 = vcmp.gt.f32.partialorder %v1111_v53, 0.1  ;;  %v648_v7 = vmul.f32 %v1361_v22, %v1486_v2  ;;  %v692_v40 = vmul.f32 %v690_v12, %v1402_v43 }
  0xe5   : > { %669 = vadd.xlane.f32.xlu1 %v646_v52  ;;  %v1498_v9 = vsel %vm560_vm10, %v576_v3, 0.0  ;;  %v693_v27 = vmul.f32 %v690_v12, %v1431_v30  ;;  %v694_v46 = vmul.f32 %v690_v12, %v1445_v15  ;;  %v696_v34 = vmul.f32 %v690_v12, %v1464_v29 }
  0xe6   : > { %v1113_v63 = vpop.eup %1112  ;;  %608 = vst [vmem:[%s1408_s10 + $0x50] sm:$0xff] %v1498_v9  ;;  %v1502_v10 = vsel %vm561_vm11, %v577_v6, 0.0  ;;  %v649_v5 = vmul.f32 %v1361_v22, %v1498_v9  ;;  %v697_v26 = vmul.f32 %v690_v12, %v1471_v60  ;;  %v698_v41 = vmul.f32 %v690_v12, %v1478_v54 }
  0xe7   : > { %v1115_v11 = vpop.eup %1114  ;;  %v578_v0 = vmul.f32 %v1113_v63, %v1426_v1  ;;  %671 = vadd.xlane.f32.xlu0 %v647_v4  ;;  %609 = vst [vmem:[%s1408_s10 + $0x58] sm:$0xff] %v1502_v10  ;;  %vm562_vm12 = vcmp.gt.f32.partialorder %v1113_v63, 0.1  ;;  %v650_v14 = vmul.f32 %v1361_v22, %v1502_v10  ;;  %v1202_v43 = vmov 0.0  }
  0xe8   : > { %v579_v13 = vmul.f32 %v1115_v11, %v1429_v21  ;;  %vm563_vm13 = vcmp.gt.f32.partialorder %v1115_v11, 0.1  ;;  %620 = vst.msk [vmem:[#allocation2 + $0x8] sm:$0xff] %vm618_vm0, %v1202_v43  ;;  %619 = vst.msk [vmem:[#allocation2] sm:$0xff] %vm618_vm0, %v1202_v43  ;;  %v699_v8 = vmul.f32 %v690_v12, %v1484_v57  ;;  %v700_v30 = vmul.f32 %v690_v12, %v1486_v2 }
  0xe9   : > { %673 = vadd.xlane.f32.xlu1 %v648_v7  ;;  %v1512_v16 = vsel %vm562_vm12, %v578_v0, 0.0  ;;  %621 = vst.msk [vmem:[#allocation2 + $0x10] sm:$0xff] %vm618_vm0, %v1202_v43  ;;  %622 = vst.msk [vmem:[#allocation2 + $0x18] sm:$0xff] %vm618_vm0, %v1202_v43  ;;  %v702_v15 = vmul.f32 %v690_v12, %v1502_v10 }
  0xea   : > { %v1117_v17 = vpop.eup %1116  ;;  %610 = vst [vmem:[%s1408_s10 + $0x60] sm:$0xff] %v1512_v16  ;;  %v1516_v1 = vsel %vm563_vm13, %v579_v13, 0.0  ;;  %v651_v20 = vmul.f32 %v1361_v22, %v1512_v16  ;;  %623 = vst.msk [vmem:[#allocation2 + $0x20] sm:$0xff] %vm618_vm0, %v1202_v43  ;;  %v703_v28 = vmul.f32 %v690_v12, %v1512_v16 }
  0xeb   : > { %v1119_v18 = vpop.eup %1118  ;;  %v580_v19 = vmul.f32 %v1117_v17, %v1442_v47  ;;  %675 = vadd.xlane.f32.xlu0 %v649_v5  ;;  %611 = vst [vmem:[%s1408_s10 + $0x68] sm:$0xff] %v1516_v1  ;;  %vm564_vm14 = vcmp.gt.f32.partialorder %v1117_v17, 0.1  ;;  %v652_v23 = vmul.f32 %v1361_v22, %v1516_v1  ;;  %624 = vst.msk [vmem:[#allocation2 + $0x28] sm:$0xff] %vm618_vm0, %v1202_v43 }
  0xec   : > { %v581_v21 = vmul.f32 %v1119_v18, %v1449_v48  ;;  %vm565_vm15 = vcmp.gt.f32.partialorder %v1119_v18, 0.1  ;;  %625 = vst.msk [vmem:[#allocation2 + $0x30] sm:$0xff] %vm618_vm0, %v1202_v43  ;;  %626 = vst.msk [vmem:[#allocation2 + $0x38] sm:$0xff] %vm618_vm0, %v1202_v43  ;;  %v701_v47 = vmul.f32 %v690_v12, %v1498_v9  ;;  %v704_v31 = vmul.f32 %v690_v12, %v1516_v1 }
  0xed   : > { %677 = vadd.xlane.f32.xlu1 %v650_v14  ;;  %v596_v24 = vsel %vm564_vm14, %v580_v19, 0.0  ;;  %627 = vst.msk [vmem:[#allocation2 + $0x40] sm:$0xff] %vm618_vm0, %v1202_v43  ;;  %628 = vst.msk [vmem:[#allocation2 + $0x48] sm:$0xff] %vm618_vm0, %v1202_v43 }
  0xee   : > { %612 = vst [vmem:[%s1408_s10 + $0x70] sm:$0xff] %v596_v24  ;;  %v597_v33 = vsel %vm565_vm15, %v581_v21, 0.0  ;;  %v653_v35 = vmul.f32 %v1361_v22, %v596_v24  ;;  %629 = vst.msk [vmem:[#allocation2 + $0x50] sm:$0xff] %vm618_vm0, %v1202_v43  ;;  %v705_v32 = vmul.f32 %v690_v12, %v596_v24 }
  0xef   : > { %679 = vadd.xlane.f32.xlu0 %v651_v20  ;;  %613 = vst [vmem:[%s1408_s10 + $0x78] sm:$0xff] %v597_v33  ;;  %v654_v38 = vmul.f32 %v1361_v22, %v597_v33  ;;  %v695_v22 = vmul.f32 %v690_v12, %v1457_v55  ;;  %630 = vst.msk [vmem:[#allocation2 + $0x58] sm:$0xff] %vm618_vm0, %v1202_v43  ;;  %v706_v48 = vmul.f32 %v690_v12, %v597_v33 }
  0xf0   : > { %631 = vst.msk [vmem:[#allocation2 + $0x60] sm:$0xff] %vm618_vm0, %v1202_v43  ;;  %632 = vst.msk [vmem:[#allocation2 + $0x68] sm:$0xff] %vm618_vm0, %v1202_v43 }
  0xf1   : > { %681 = vadd.xlane.f32.xlu1 %v652_v23  ;;  %633 = vst.msk [vmem:[#allocation2 + $0x70] sm:$0xff] %vm618_vm0, %v1202_v43  ;;  %634 = vst.msk [vmem:[#allocation2 + $0x78] sm:$0xff] %vm618_vm0, %v1202_v43 }
  0xf3   : > { %683 = vadd.xlane.f32.xlu0 %v653_v35 }
  0xf5   : > { %685 = vadd.xlane.f32.xlu1 %v654_v38 }
  0xf7   : > { %707 = vadd.xlane.f32.xlu0 %v691_v39 }
  0xf9   : > { %709 = vadd.xlane.f32.xlu1 %v692_v40 }
  0xfb   : > { %711 = vadd.xlane.f32.xlu0 %v693_v27 }
  0xfd   : > { %713 = vadd.xlane.f32.xlu1 %v694_v46 }
  0xff   : > { %715 = vadd.xlane.f32.xlu0 %v695_v22 }
 0x101   : > { %717 = vadd.xlane.f32.xlu1 %v696_v34 }
 0x103   : > { %719 = vadd.xlane.f32.xlu0 %v697_v26 }
 0x105   : > { %721 = vadd.xlane.f32.xlu1 %v698_v41 }
 0x107   : > { %723 = vadd.xlane.f32.xlu0 %v699_v8 }
 0x109   : > { %725 = vadd.xlane.f32.xlu1 %v700_v30 }
 0x10b   : > { %727 = vadd.xlane.f32.xlu0 %v701_v47 }
 0x10d   : > { %729 = vadd.xlane.f32.xlu1 %v702_v15 }
 0x10f   : > { %731 = vadd.xlane.f32.xlu0 %v703_v28 }
 0x111   : > { %733 = vadd.xlane.f32.xlu1 %v704_v31 }
 0x113   : > { %735 = vadd.xlane.f32.xlu0 %v705_v32 }
 0x115   : > { %737 = vadd.xlane.f32.xlu1 %v706_v48 }
 0x116   : > { %1133 = shalt.err (!%p1130_p5)
}
 0x117   : > { %s1134_s5 = scalar_lea.hbm %s1568_s23, 2048  ;;  %s1138_s8 = scalar_lea.hbm %s1714_s2, 4096 }
 0x118   : > { %p1135_p6 = scmp.ne.s32.totalorder %s1568_s23, %s1134_s5  ;;  %p1139_p10 = scmp.lt.u32.totalorder %s1568_s23, %s1714_s2 }
 0x119   : > { %p1140_p11 = scmp.lt.u32.totalorder %s1138_s8, %s1134_s5  ;;  %p1142_p13 = scmp.lt.u32.totalorder %s1134_s5, %s1568_s23 }
 0x11a   : > { %p1136_p7 = pnand %p1135_p6, %p1266_p4 }
 0x11b   : > { %p1141_p12 = por %p1140_p11, %p1139_p10 }
 0x11c   : > { %p1137_p9 = pneg %p1136_p7 }
 0x11d   : > { %p1143_p0 = por %p1142_p13, %p1141_p12 }
 0x11f   : > { %p1144_p1 = pnand %p1143_p0, %p1137_p9 }
 0x121   : > { %1147 = shalt.err (!%p1144_p1)
}
 0x122   : > { %s1204_s11 = smov 128   ;;  %s1205_s19 = smov 8   ;;  %vm755_vm1 = vcmask 7168   ;;  %v739_v54 = vld [vmem:[#allocation2] sm:$0xff]  ;;  %v740_v52 = vld [vmem:[#allocation2 + $0x8] sm:$0xff]  ;;  %v741_v4 = vld [vmem:[#allocation2 + $0x10] sm:$0xff] }
 0x123   : > { %1024 = dma.vmem_to_hbm [thread:$0]  (%p1266_p4), %s1570_s18, 2048, %s1568_s23, %s1574_s28, %s1204_s11, %s1204_s11, %s1205_s19   ;;  %v742_v9 = vld [vmem:[#allocation2 + $0x18] sm:$0xff]  ;;  %v743_v5 = vld [vmem:[#allocation2 + $0x20] sm:$0xff]  ;;  %v744_v16 = vld [vmem:[#allocation2 + $0x28] sm:$0xff] }
 0x124   : > { %s1624_s21 = scalar_lea.vmem %s1715_s3, %s1021_s27  ;;  %v745_v21 = vld [vmem:[#allocation2 + $0x30] sm:$0xff]  ;;  %v746_v35 = vld [vmem:[#allocation2 + $0x38] sm:$0xff]  ;;  %v747_v46 = vld [vmem:[#allocation2 + $0x40] sm:$0xff] }
 0x125   : > { %v748_v41 = vld [vmem:[#allocation2 + $0x48] sm:$0xff]  ;;  %v749_v28 = vld [vmem:[#allocation2 + $0x50] sm:$0xff] }
 0x161   : > { %v658_v45 = vpop.xlane.xlu0 %657 }
 0x164   : > { %v656_v50 = vpop.xlane.xlu1 %655 }
 0x168   : > { %v660_v51 = vpop.xlane.xlu0 %659 }
 0x16a   : > { %v662_v55 = vpop.xlane.xlu1 %661 }
 0x16c   : > { %v664_v25 = vpop.xlane.xlu0 %663 }
 0x16e   : > { %v666_v49 = vpop.xlane.xlu1 %665 }
 0x170   : > { %v668_v56 = vpop.xlane.xlu0 %667 }
 0x172   : > { %v670_v36 = vpop.xlane.xlu1 %669 }
 0x174   : > { %v672_v29 = vpop.xlane.xlu0 %671 }
 0x176   : > { %v1598_v37 = vpop.xlane.xlu1 %673 }
 0x178   : > { %v1600_v58 = vpop.xlane.xlu0 %675 }
 0x17a   : > { %v1602_v59 = vpop.xlane.xlu1 %677 }
 0x17c   : > { %v1604_v42 = vpop.xlane.xlu0 %679 }
 0x17e   : > { %v1606_v60 = vpop.xlane.xlu1 %681 }
 0x180   : > { %v1608_v61 = vpop.xlane.xlu0 %683 }
 0x182   : > { %v1610_v62 = vpop.xlane.xlu1 %685 }
 0x184   : > { %v708_v44 = vpop.xlane.xlu0 %707 }
 0x185   : > { %v756_v57 = vsel %vm755_vm1, %v656_v50, %v708_v44 }
 0x186   : > { %v710_v2 = vpop.xlane.xlu1 %709  ;;  %v772_v53 = vadd.f32 %v756_v57, %v739_v54 }
 0x187   : > { %v757_v3 = vsel %vm755_vm1, %v658_v45, %v710_v2  ;;  %v750_v45 = vld [vmem:[#allocation2 + $0x58] sm:$0xff]  ;;  %v753_v2 = vld [vmem:[#allocation2 + $0x70] sm:$0xff] }
 0x188   : > { %v773_v6 = vadd.f32 %v757_v3, %v740_v52  ;;  %789 = vst.msk [vmem:[#allocation2] sm:$0xff] %vm618_vm0, %v772_v53  ;;  %v712_v7 = vpop.xlane.xlu0 %711 }
 0x189   : > { %v758_v63 = vsel %vm755_vm1, %v660_v51, %v712_v7 }
 0x18a   : > { %790 = vst.msk [vmem:[#allocation2 + $0x8] sm:$0xff] %vm618_vm0, %v773_v6  ;;  %v714_v10 = vpop.xlane.xlu1 %713  ;;  %v774_v11 = vadd.f32 %v758_v63, %v741_v4  ;;  %v754_v4 = vld [vmem:[#allocation2 + $0x78] sm:$0xff] }
 0x18b   : > { %v759_v0 = vsel %vm755_vm1, %v662_v55, %v714_v10 }
 0x18c   : > { %v775_v13 = vadd.f32 %v759_v0, %v742_v9  ;;  %791 = vst.msk [vmem:[#allocation2 + $0x10] sm:$0xff] %vm618_vm0, %v774_v11  ;;  %v716_v14 = vpop.xlane.xlu0 %715 }
 0x18d   : > { %v760_v17 = vsel %vm755_vm1, %v664_v25, %v716_v14 }
 0x18e   : > { %792 = vst.msk [vmem:[#allocation2 + $0x18] sm:$0xff] %vm618_vm0, %v775_v13  ;;  %v718_v1 = vpop.xlane.xlu1 %717  ;;  %v776_v18 = vadd.f32 %v760_v17, %v743_v5 }
 0x18f   : > { %v808_v19 = vld [vmem:[#allocation2] sm:$0xff]  ;;  %v761_v20 = vsel %vm755_vm1, %v666_v49, %v718_v1 }
 0x190   : > { %824 = vst.msk [vmem:[%s1624_s21] sm:$0xff] %vm618_vm0, %v808_v19  ;;  %v777_v23 = vadd.f32 %v761_v20, %v744_v16  ;;  %793 = vst.msk [vmem:[#allocation2 + $0x20] sm:$0xff] %vm618_vm0, %v776_v18  ;;  %v720_v24 = vpop.xlane.xlu0 %719 }
 0x191   : > { %v809_v33 = vld [vmem:[#allocation2 + $0x8] sm:$0xff]  ;;  %v762_v38 = vsel %vm755_vm1, %v668_v56, %v720_v24  ;;  %v751_v56 = vld [vmem:[#allocation2 + $0x60] sm:$0xff] }
 0x192   : > { %825 = vst.msk [vmem:[%s1624_s21 + $0x8] sm:$0xff] %vm618_vm0, %v809_v33  ;;  %794 = vst.msk [vmem:[#allocation2 + $0x28] sm:$0xff] %vm618_vm0, %v777_v23  ;;  %v722_v12 = vpop.xlane.xlu1 %721  ;;  %v778_v39 = vadd.f32 %v762_v38, %v745_v21 }
 0x193   : > { %v810_v40 = vld [vmem:[#allocation2 + $0x10] sm:$0xff]  ;;  %v763_v27 = vsel %vm755_vm1, %v670_v36, %v722_v12 }
 0x194   : > { %826 = vst.msk [vmem:[%s1624_s21 + $0x10] sm:$0xff] %vm618_vm0, %v810_v40  ;;  %v779_v22 = vadd.f32 %v763_v27, %v746_v35  ;;  %795 = vst.msk [vmem:[#allocation2 + $0x30] sm:$0xff] %vm618_vm0, %v778_v39  ;;  %v724_v34 = vpop.xlane.xlu0 %723 }
 0x195   : > { %v811_v26 = vld [vmem:[#allocation2 + $0x18] sm:$0xff]  ;;  %v764_v43 = vsel %vm755_vm1, %v672_v29, %v724_v34 }
 0x196   : > { %827 = vst.msk [vmem:[%s1624_s21 + $0x18] sm:$0xff] %vm618_vm0, %v811_v26  ;;  %796 = vst.msk [vmem:[#allocation2 + $0x38] sm:$0xff] %vm618_vm0, %v779_v22  ;;  %v726_v8 = vpop.xlane.xlu1 %725  ;;  %v780_v30 = vadd.f32 %v764_v43, %v747_v46 }
 0x197   : > { %v812_v47 = vld [vmem:[#allocation2 + $0x20] sm:$0xff]  ;;  %v765_v15 = vsel %vm755_vm1, %v1598_v37, %v726_v8 }
 0x198   : > { %828 = vst.msk [vmem:[%s1624_s21 + $0x20] sm:$0xff] %vm618_vm0, %v812_v47  ;;  %v781_v31 = vadd.f32 %v765_v15, %v748_v41  ;;  %797 = vst.msk [vmem:[#allocation2 + $0x40] sm:$0xff] %vm618_vm0, %v780_v30  ;;  %v728_v32 = vpop.xlane.xlu0 %727 }
 0x199   : > { %v813_v48 = vld [vmem:[#allocation2 + $0x28] sm:$0xff]  ;;  %v766_v50 = vsel %vm755_vm1, %v1600_v58, %v728_v32 }
 0x19a   : > { %829 = vst.msk [vmem:[%s1624_s21 + $0x28] sm:$0xff] %vm618_vm0, %v813_v48  ;;  %798 = vst.msk [vmem:[#allocation2 + $0x48] sm:$0xff] %vm618_vm0, %v781_v31  ;;  %v730_v51 = vpop.xlane.xlu1 %729  ;;  %v782_v55 = vadd.f32 %v766_v50, %v749_v28  ;;  %v752_v58 = vld [vmem:[#allocation2 + $0x68] sm:$0xff] }
 0x19b   : > { %v814_v25 = vld [vmem:[#allocation2 + $0x30] sm:$0xff]  ;;  %v767_v49 = vsel %vm755_vm1, %v1602_v59, %v730_v51 }
 0x19c   : > { %830 = vst.msk [vmem:[%s1624_s21 + $0x30] sm:$0xff] %vm618_vm0, %v814_v25  ;;  %v783_v36 = vadd.f32 %v767_v49, %v750_v45  ;;  %799 = vst.msk [vmem:[#allocation2 + $0x50] sm:$0xff] %vm618_vm0, %v782_v55  ;;  %v732_v29 = vpop.xlane.xlu0 %731 }
 0x19d   : > { %v815_v37 = vld [vmem:[#allocation2 + $0x38] sm:$0xff]  ;;  %v768_v54 = vsel %vm755_vm1, %v1604_v42, %v732_v29 }
 0x19e   : > { %831 = vst.msk [vmem:[%s1624_s21 + $0x38] sm:$0xff] %vm618_vm0, %v815_v37  ;;  %800 = vst.msk [vmem:[#allocation2 + $0x58] sm:$0xff] %vm618_vm0, %v783_v36  ;;  %v734_v44 = vpop.xlane.xlu1 %733  ;;  %v784_v59 = vadd.f32 %v768_v54, %v751_v56 }
 0x19f   : > { %v816_v52 = vld [vmem:[#allocation2 + $0x40] sm:$0xff]  ;;  %v769_v57 = vsel %vm755_vm1, %v1606_v60, %v734_v44 }
 0x1a0   : > { %832 = vst.msk [vmem:[%s1624_s21 + $0x40] sm:$0xff] %vm618_vm0, %v816_v52  ;;  %v785_v53 = vadd.f32 %v769_v57, %v752_v58  ;;  %801 = vst.msk [vmem:[#allocation2 + $0x60] sm:$0xff] %vm618_vm0, %v784_v59  ;;  %v736_v3 = vpop.xlane.xlu0 %735 }
 0x1a1   : > { %v817_v42 = vld [vmem:[#allocation2 + $0x48] sm:$0xff]  ;;  %v770_v6 = vsel %vm755_vm1, %v1608_v61, %v736_v3 }
 0x1a2   : > { %833 = vst.msk [vmem:[%s1624_s21 + $0x48] sm:$0xff] %vm618_vm0, %v817_v42  ;;  %802 = vst.msk [vmem:[#allocation2 + $0x68] sm:$0xff] %vm618_vm0, %v785_v53  ;;  %v738_v60 = vpop.xlane.xlu1 %737  ;;  %v786_v7 = vadd.f32 %v770_v6, %v753_v2 }
 0x1a3   : > { %v818_v9 = vld [vmem:[#allocation2 + $0x50] sm:$0xff]  ;;  %v771_v63 = vsel %vm755_vm1, %v1610_v62, %v738_v60 }
 0x1a4   : > { %834 = vst.msk [vmem:[%s1624_s21 + $0x50] sm:$0xff] %vm618_vm0, %v818_v9  ;;  %v787_v10 = vadd.f32 %v771_v63, %v754_v4  ;;  %803 = vst.msk [vmem:[#allocation2 + $0x70] sm:$0xff] %vm618_vm0, %v786_v7 }
 0x1a5   : > { %v819_v11 = vld [vmem:[#allocation2 + $0x58] sm:$0xff] }
 0x1a6   : > { %835 = vst.msk [vmem:[%s1624_s21 + $0x58] sm:$0xff] %vm618_vm0, %v819_v11  ;;  %804 = vst.msk [vmem:[#allocation2 + $0x78] sm:$0xff] %vm618_vm0, %v787_v10 }
 0x1a7   : > { %v820_v61 = vld [vmem:[#allocation2 + $0x60] sm:$0xff] }
 0x1a8   : > { %836 = vst.msk [vmem:[%s1624_s21 + $0x60] sm:$0xff] %vm618_vm0, %v820_v61 }
 0x1a9   : > { %v821_v0 = vld [vmem:[#allocation2 + $0x68] sm:$0xff] }
 0x1aa   : > { %837 = vst.msk [vmem:[%s1624_s21 + $0x68] sm:$0xff] %vm618_vm0, %v821_v0 }
 0x1ab   : > { %v822_v5 = vld [vmem:[#allocation2 + $0x70] sm:$0xff] }
 0x1ac   : > { %838 = vst.msk [vmem:[%s1624_s21 + $0x70] sm:$0xff] %vm618_vm0, %v822_v5 }
 0x1ad   : > { %v823_v62 = vld [vmem:[#allocation2 + $0x78] sm:$0xff] }
 0x1ae   : > { %839 = vst.msk [vmem:[%s1624_s21 + $0x78] sm:$0xff] %vm618_vm0, %v823_v62 }
 0x1af PF: > { %p1030_p4 = scmp.ge.s32.totalorder %s1198_s17, 2  ;;  %s885_s26 = sand.u32 1, %s1178_s12  }
 0x1b0   : > { %s886_s27 = scalar_lea.sflag [#allocation4], %s885_s26 }
 0x1b1   : > { %p1027_p2 = pnand %p1030_p4, %p1273_p8 }
 0x1b3   : > { %1173 = dma.done.wait (!%p1027_p2), %s886_s27, 2048  }
 0x1b4   : > { %1175 = vsyncadd (!%p1027_p2), %s886_s27, 4294965248  ;;  %s17_s17 = sadd.s32 1, %s1198_s17   ;;  %s1718_s12 = smov %s1182_s13 }
 0x1b5   : > { %p14_p3 = scmp.ge.s32.totalorder %s17_s17, 4   ;;  %s1719_s13 = smov %s1186_s14 }
 0x1b6   : > { %s1720_s14 = smov %s1279_s25  ;;  %s1721_s15 = smov %s1194_s16 }
 0x1b7   : > { %s1722_s16 = smov %s1724_s20  ;;  %16 = sbr.rel (!%p14_p3) target bundleno = 4 (0x4), region = 86 }
 0x1be   :  { %903 = vsyncpa [#allocation4], 1 }
 0x1bf   :  { %905 = vsyncpa [#allocation4 + $0x1], 1 }

</bundles_post_ra>
